<compile_context>
chip_gen: v7x
topology: tpu7x:2x2x1
jax: 0.10.0
libtpu: 0.0.40
codegen_flags: <defaults>
</compile_context>

<pallas_src>
import jax
import jax.numpy as jnp
from jax.experimental import pallas as pl
from jax.experimental.pallas import tpu as pltpu

# ---- config (mirrors ModelConfig where it matters) ----
N_EMBD = 32
N_HEAD = 2
HEAD_SIZE = N_EMBD // N_HEAD        # 16
HIDDEN = 4 * N_EMBD                 # 128
QKV_W = (2 + N_HEAD) * N_EMBD       # 128 = [Q(32) | K(32) | V'(2*32)]
LN_EPS = 1e-5

# target number of flattened rows (M = b_blk * T) per grid step
_TARGET_ROWS = 1024


def _block_kernel(x_ref,
                  wqkv_ref, bqkv_ref, bproj_ref,
                  w1_ref, b1_ref, w2_ref, b2_ref,
                  o_ref):
    b_blk, T, C = x_ref.shape                       # static block shape
    M = b_blk * T

    x = x_ref[...].reshape(M, C)                    # (M, C) fp32 slab

    # ---- LayerNorm 1 (affine folded into wqkv/bqkv host-side) ----
    mu = jnp.mean(x, axis=-1, keepdims=True)
    var = jnp.mean((x - mu) ** 2, axis=-1, keepdims=True)
    xn = (x - mu) * jax.lax.rsqrt(var + LN_EPS)

    # ---- fused Q|K|V' projection: one (M,32)x(32,128) matmul, 128 lanes ----
    qkv = jnp.dot(xn, wqkv_ref[...],
                  preferred_element_type=jnp.float32) + bqkv_ref[0]    # (M, 128)

    # ---- additive causal mask, built + broadcast ONCE (outside head loop) ----
    row = jax.lax.broadcasted_iota(jnp.int32, (T, T), 0)
    col = jax.lax.broadcasted_iota(jnp.int32, (T, T), 1)
    addmask = jnp.where(row >= col, 0.0, -jnp.inf).astype(jnp.float32)  # (T, T)
    addmask = jnp.broadcast_to(addmask[None], (b_blk, T, T))

    # ---- per-head attention; Wproj already folded into V' so each head
    #      contributes a (b_blk, T, C) slab directly (no concat, no proj) ----
    sa = None
    for h in range(N_HEAD):                          # static loop, 2 heads
        q = qkv[:, h * HEAD_SIZE:(h + 1) * HEAD_SIZE].reshape(b_blk, T, HEAD_SIZE)
        k = qkv[:, C + h * HEAD_SIZE: C + (h + 1) * HEAD_SIZE].reshape(b_blk, T, HEAD_SIZE)
        v = qkv[:, 2 * C + h * C: 2 * C + (h + 1) * C].reshape(b_blk, T, C)

        wei = jnp.einsum('bqd,bkd->bqk', q, k,
                         preferred_element_type=jnp.float32)     # (b_blk, T, T)
        wei = wei + addmask                                      # diag always unmasked
        wei = wei - jnp.max(wei, axis=-1, keepdims=True)
        p = jnp.exp(wei)
        denom = jnp.sum(p, axis=-1, keepdims=True)
        p = p * pl.reciprocal(denom, approx=False)               # EUP reciprocal

        ho = jnp.einsum('bqk,bkd->bqd', p, v,
                        preferred_element_type=jnp.float32)      # (b_blk, T, C)
        sa = ho if sa is None else sa + ho

    x1 = x + sa.reshape(M, C) + bproj_ref[0]         # residual 1 (+ deferred bproj)

    # ---- LayerNorm 2 (affine folded into w1/b1 host-side) ----
    mu2 = jnp.mean(x1, axis=-1, keepdims=True)
    var2 = jnp.mean((x1 - mu2) ** 2, axis=-1, keepdims=True)
    xn2 = (x1 - mu2) * jax.lax.rsqrt(var2 + LN_EPS)

    # ---- FeedForward: Linear -> ReLU -> Linear (dropout p=0.0 is identity) ----
    h1 = jnp.dot(xn2, w1_ref[...], preferred_element_type=jnp.float32) + b1_ref[0]
    h1 = jnp.maximum(h1, 0.0)
    ff = jnp.dot(h1, w2_ref[...], preferred_element_type=jnp.float32) + b2_ref[0]

    out = x1 + ff                                    # residual 2
    o_ref[...] = out.reshape(b_blk, T, C).astype(o_ref.dtype)


def _prep_weights(p):
    """Host-side algebraic folds (exact up to fp re-association)."""
    scale = HEAD_SIZE ** (-0.5)
    # fold the output projection into V (per head): V'_h = Wv_h @ Wproj_h  -> (C, C)
    wv_folded = jnp.concatenate(
        [p["wv"][:, h * HEAD_SIZE:(h + 1) * HEAD_SIZE]
         @ p["wproj"][h * HEAD_SIZE:(h + 1) * HEAD_SIZE, :]
         for h in range(N_HEAD)], axis=1)                                  # (C, N_HEAD*C)
    # fuse Q|K|V'; fold attention scale into Q columns
    w_total = jnp.concatenate([p["wq"] * scale, p["wk"], wv_folded], axis=1)  # (C, QKV_W)
    # fold LN1 affine:  (xn*g1 + b1) @ W  ==  xn @ (diag(g1) W) + (b1 @ W)
    wqkv = p["ln1g"][0][:, None] * w_total
    bqkv = (p["ln1b"][0] @ w_total)[None, :]                               # (1, QKV_W)
    # fold LN2 affine into first FF linear
    w1 = p["ln2g"][0][:, None] * p["w1"]
    b1 = (p["ln2b"][0] @ p["w1"] + p["b1"][0])[None, :]                    # (1, HIDDEN)
    return wqkv, bqkv, p["bproj"], w1, b1, p["w2"], p["b2"]


def block_forward(x, params, b_blk=None, target_rows=_TARGET_ROWS):
    """x: (B, T, C) float32. params: dict of weights (see init_params)."""
    B, T, C = x.shape
    assert C == N_EMBD

    # pick a batch block so that M = b_blk*T fills the MXU M dim / amortizes
    # per-step overhead; keep >= 2 grid steps when B > 1 so v7x's 2nd core works.
    if b_blk is None:
        b_blk = max(1, min(B, max(1, target_rows // T)))
        if B > 1 and pl.cdiv(B, b_blk) < 2:
            b_blk = pl.cdiv(B, 2)
    num_blocks = pl.cdiv(B, b_blk)
    B_pad = num_blocks * b_blk
    if B_pad != B:
        # zero-padded rows are numerically safe (LN of zeros, masked softmax)
        x_in = jnp.concatenate(
            [x, jnp.zeros((B_pad - B, T, C), x.dtype)], axis=0)
    else:
        x_in = x

    wqkv, bqkv, bproj, w1, b1, w2, b2 = _prep_weights(params)
    operands = (x_in, wqkv, bqkv, bproj, w1, b1, w2, b2)

    def full_spec(shape):
        nd = len(shape)
        return pl.BlockSpec(shape, lambda b, _nd=nd: (0,) * _nd)

    in_specs = [pl.BlockSpec((b_blk, T, C), lambda b: (b, 0, 0))]
    in_specs += [full_spec(op.shape) for op in operands[1:]]

    out = pl.pallas_call(
        _block_kernel,
        out_shape=jax.ShapeDtypeStruct((B_pad, T, C), x.dtype),
        grid_spec=pltpu.PrefetchScalarGridSpec(
            num_scalar_prefetch=0,
            grid=(num_blocks,),
            in_specs=in_specs,
            out_specs=pl.BlockSpec((b_blk, T, C), lambda b: (b, 0, 0)),
        ),
        compiler_params=pltpu.CompilerParams(
            dimension_semantics=("parallel",),
            vmem_limit_bytes=48 * 1024 * 1024),
    )(*operands)

    return out[:B] if B_pad != B else out


def init_params(key):
    """Deterministic parameter init.  Linear weights ~ N(0, 0.02), biases 0,
    LayerNorm gamma=1 / beta=0 (PyTorch defaults)."""
    ks = jax.random.split(key, 6)
    std = 0.02
    return {
        # per-head key/query/value weights concatenated along the output dim,
        # stored so that  x @ W  == PyTorch  x @ weight.T
        "wk": std * jax.random.normal(ks[0], (N_EMBD, N_HEAD * HEAD_SIZE), jnp.float32),
        "wq": std * jax.random.normal(ks[1], (N_EMBD, N_HEAD * HEAD_SIZE), jnp.float32),
        "wv": std * jax.random.normal(ks[2], (N_EMBD, N_HEAD * HEAD_SIZE), jnp.float32),
        "wproj": std * jax.random.normal(ks[3], (N_HEAD * HEAD_SIZE, N_EMBD), jnp.float32),
        "bproj": jnp.zeros((1, N_EMBD), jnp.float32),
        "ln1g": jnp.ones((1, N_EMBD), jnp.float32),
        "ln1b": jnp.zeros((1, N_EMBD), jnp.float32),
        "ln2g": jnp.ones((1, N_EMBD), jnp.float32),
        "ln2b": jnp.zeros((1, N_EMBD), jnp.float32),
        "w1": std * jax.random.normal(ks[4], (N_EMBD, HIDDEN), jnp.float32),
        "b1": jnp.zeros((1, HIDDEN), jnp.float32),
        "w2": std * jax.random.normal(ks[5], (HIDDEN, N_EMBD), jnp.float32),
        "b2": jnp.zeros((1, N_EMBD), jnp.float32),
    }


def block_reference(x, p):
    """Pure-JAX reference matching the PyTorch forward exactly (unfolded weights)."""
    def ln(z, g, b):
        mu = jnp.mean(z, axis=-1, keepdims=True)
        var = jnp.mean((z - mu) ** 2, axis=-1, keepdims=True)
        return (z - mu) * jax.lax.rsqrt(var + LN_EPS) * g + b

    B, T, C = x.shape
    xn = ln(x, p["ln1g"][0], p["ln1b"][0])
    k = xn @ p["wk"]
    q = xn @ p["wq"]
    v = xn @ p["wv"]
    tril = jnp.tril(jnp.ones((T, T), bool))
    outs = []
    for h in range(N_HEAD):
        sl = slice(h * HEAD_SIZE, (h + 1) * HEAD_SIZE)
        wei = q[..., sl] @ jnp.swapaxes(k[..., sl], -1, -2) * HEAD_SIZE ** (-0.5)
        wei = jnp.where(tril, wei, -jnp.inf)
        wei = jax.nn.softmax(wei, axis=-1)
        outs.append(wei @ v[..., sl])
    att = jnp.concatenate(outs, axis=-1)
    x1 = x + att @ p["wproj"] + p["bproj"][0]
    xn2 = ln(x1, p["ln2g"][0], p["ln2b"][0])
    ff = jnp.maximum(xn2 @ p["w1"] + p["b1"][0], 0.0) @ p["w2"] + p["b2"][0]
    return x1 + ff


if __name__ == "__main__":
    key = jax.random.PRNGKey(0)
    k_x, k_p, k_x2 = jax.random.split(key, 3)

    params = init_params(k_p)

    # small case: B=2, T=8 (T <= block_size 32); exercises the 2-step grid
    B, T = 2, 8
    x = jax.random.normal(k_x, (B, T, N_EMBD), jnp.float32)
    out = jax.block_until_ready(block_forward(x, params))
    ref = block_reference(x, params)
    assert out.shape == (B, T, N_EMBD)
    assert jnp.allclose(out, ref, atol=1e-5, rtol=1e-5), "mismatch vs JAX reference (small)"

    # larger case: exercises batch padding + multi-step grid at T = block_size
    x2 = jax.random.normal(k_x2, (10, 32, N_EMBD), jnp.float32)
    out2 = jax.block_until_ready(block_forward(x2, params, b_blk=4))
    ref2 = block_reference(x2, params)
    assert out2.shape == x2.shape
    assert jnp.allclose(out2, ref2, atol=1e-5, rtol=1e-5), "mismatch vs JAX reference (padded)"

    print("KERNEL_OK")
</pallas_src>

<mosaic_0001>
module attributes {stable_mosaic.version = 11 : i64} {
  func.func @_block_kernel(%arg0: i32, %arg1: memref<1x8x32xf32, #tpu.memory_space<vmem>>, %arg2: memref<32x128xf32, #tpu.memory_space<vmem>>, %arg3: memref<1x128xf32, #tpu.memory_space<vmem>>, %arg4: memref<1x32xf32, #tpu.memory_space<vmem>>, %arg5: memref<32x128xf32, #tpu.memory_space<vmem>>, %arg6: memref<1x128xf32, #tpu.memory_space<vmem>>, %arg7: memref<128x32xf32, #tpu.memory_space<vmem>>, %arg8: memref<1x32xf32, #tpu.memory_space<vmem>>, %arg9: memref<1x8x32xf32, #tpu.memory_space<vmem>>) attributes {dimension_semantics = [#tpu.dimension_semantics<parallel>], iteration_bounds = array<i64: 2>, scalar_prefetch = 0 : i64, scratch_operands = 0 : i64, tpu.core_type = #tpu.core_type<tc>, window_params = [{transform_indices = @transform_0, window_bounds = array<i64: 1, 8, 32>}, {pipeline_mode = #tpu.pipeline_mode<synchronous>, transform_indices = @transform_1, window_bounds = array<i64: 32, 128>}, {pipeline_mode = #tpu.pipeline_mode<synchronous>, transform_indices = @transform_2, window_bounds = array<i64: 1, 128>}, {pipeline_mode = #tpu.pipeline_mode<synchronous>, transform_indices = @transform_3, window_bounds = array<i64: 1, 32>}, {pipeline_mode = #tpu.pipeline_mode<synchronous>, transform_indices = @transform_4, window_bounds = array<i64: 32, 128>}, {pipeline_mode = #tpu.pipeline_mode<synchronous>, transform_indices = @transform_5, window_bounds = array<i64: 1, 128>}, {pipeline_mode = #tpu.pipeline_mode<synchronous>, transform_indices = @transform_6, window_bounds = array<i64: 128, 32>}, {pipeline_mode = #tpu.pipeline_mode<synchronous>, transform_indices = @transform_7, window_bounds = array<i64: 1, 32>}, {transform_indices = @transform_8, window_bounds = array<i64: 1, 8, 32>}]} {
    %c0 = arith.constant 0 : index
    %c0_0 = arith.constant 0 : index
    %c0_1 = arith.constant 0 : index
    %0 = vector.load %arg1[%c0, %c0_0, %c0_1] : memref<1x8x32xf32, #tpu.memory_space<vmem>>, vector<1x8x32xf32>
    %1 = vector.shape_cast %0 : vector<1x8x32xf32> to vector<8x32xf32>
    %cst = arith.constant dense<0.000000e+00> : vector<8xf32>
    %2 = vector.multi_reduction <add>, %1, %cst [1] : vector<8x32xf32> to vector<8xf32>
    %3 = vector.shape_cast %2 : vector<8xf32> to vector<8x1xf32>
    %cst_2 = arith.constant 3.200000e+01 : f32
    %4 = vector.broadcast %cst_2 : f32 to vector<8x1xf32>
    %5 = arith.divf %3, %4 : vector<8x1xf32>
    %6 = vector.broadcast %5 : vector<8x1xf32> to vector<8x32xf32>
    %7 = arith.subf %1, %6 : vector<8x32xf32>
    %8 = arith.mulf %7, %7 : vector<8x32xf32>
    %cst_3 = arith.constant dense<0.000000e+00> : vector<8xf32>
    %9 = vector.multi_reduction <add>, %8, %cst_3 [1] : vector<8x32xf32> to vector<8xf32>
    %10 = vector.shape_cast %9 : vector<8xf32> to vector<8x1xf32>
    %cst_4 = arith.constant 3.200000e+01 : f32
    %11 = vector.broadcast %cst_4 : f32 to vector<8x1xf32>
    %12 = arith.divf %10, %11 : vector<8x1xf32>
    %13 = vector.broadcast %5 : vector<8x1xf32> to vector<8x32xf32>
    %14 = arith.subf %1, %13 : vector<8x32xf32>
    %cst_5 = arith.constant 9.99999974E-6 : f32
    %15 = vector.broadcast %cst_5 : f32 to vector<8x1xf32>
    %16 = arith.addf %12, %15 : vector<8x1xf32>
    %17 = math.rsqrt %16 : vector<8x1xf32>
    %18 = vector.broadcast %17 : vector<8x1xf32> to vector<8x32xf32>
    %19 = arith.mulf %14, %18 : vector<8x32xf32>
    %c0_6 = arith.constant 0 : index
    %c0_7 = arith.constant 0 : index
    %20 = vector.load %arg2[%c0_6, %c0_7] : memref<32x128xf32, #tpu.memory_space<vmem>>, vector<32x128xf32>
    %cst_8 = arith.constant dense<0.000000e+00> : vector<8x128xf32>
    %21 = tpu.matmul %19, %20, %cst_8 {dimension_numbers = #tpu.dot_dimension_numbers<[1], [0], [0], [1], [0, 0, 1, 1], [], []>} : vector<8x32xf32>, vector<32x128xf32>, vector<8x128xf32> -> vector<8x128xf32>
    %c0_9 = arith.constant 0 : index
    %c0_10 = arith.constant 0 : index
    %22 = vector.load %arg3[%c0_9, %c0_10] : memref<1x128xf32, #tpu.memory_space<vmem>>, vector<1x128xf32>
    %23 = vector.shape_cast %22 : vector<1x128xf32> to vector<128xf32>
    %24 = vector.shape_cast %23 : vector<128xf32> to vector<1x128xf32>
    %25 = vector.broadcast %24 : vector<1x128xf32> to vector<8x128xf32>
    %26 = arith.addf %21, %25 : vector<8x128xf32>
    %27 = tpu.iota {dimensions = array<i32: 0>} : vector<8x8xi32>
    %28 = tpu.iota {dimensions = array<i32: 1>} : vector<8x8xi32>
    %29 = arith.cmpi sge, %27, %28 : vector<8x8xi32>
    %cst_11 = arith.constant 0.000000e+00 : f32
    %cst_12 = arith.constant 0xFF800000 : f32
    %30 = vector.broadcast %cst_11 : f32 to vector<8x8xf32>
    %31 = vector.broadcast %cst_12 : f32 to vector<8x8xf32>
    %32 = arith.select %29, %30, %31 : vector<8x8xi1>, vector<8x8xf32>
    %33 = vector.shape_cast %32 : vector<8x8xf32> to vector<1x8x8xf32>
    %34 = vector.extract_strided_slice %26 {offsets = [0, 0], sizes = [8, 16], strides = [1, 1]} : vector<8x128xf32> to vector<8x16xf32>
    %35 = vector.shape_cast %34 : vector<8x16xf32> to vector<1x8x16xf32>
    %36 = vector.extract_strided_slice %26 {offsets = [0, 32], sizes = [8, 16], strides = [1, 1]} : vector<8x128xf32> to vector<8x16xf32>
    %37 = vector.shape_cast %36 : vector<8x16xf32> to vector<1x8x16xf32>
    %38 = vector.extract_strided_slice %26 {offsets = [0, 64], sizes = [8, 32], strides = [1, 1]} : vector<8x128xf32> to vector<8x32xf32>
    %39 = vector.shape_cast %38 : vector<8x32xf32> to vector<1x8x32xf32>
    "tpu.trace_start"() <{level = 10 : i32, message = "bqd,bkd->bqk"}> : () -> ()
    %cst_13 = arith.constant dense<0.000000e+00> : vector<1x8x8xf32>
    %40 = tpu.matmul %35, %37, %cst_13 {dimension_numbers = #tpu.dot_dimension_numbers<[2], [2], [1], [1], [0, 0, 0, 1, 1, 1], [0], [0]>} : vector<1x8x16xf32>, vector<1x8x16xf32>, vector<1x8x8xf32> -> vector<1x8x8xf32>
    "tpu.trace_stop"() : () -> ()
    %41 = arith.addf %40, %33 : vector<1x8x8xf32>
    %cst_14 = arith.constant dense<0xFF800000> : vector<1x8xf32>
    %42 = vector.multi_reduction <maximumf>, %41, %cst_14 [2] : vector<1x8x8xf32> to vector<1x8xf32>
    %43 = vector.shape_cast %42 : vector<1x8xf32> to vector<1x8x1xf32>
    %44 = vector.broadcast %43 : vector<1x8x1xf32> to vector<1x8x8xf32>
    %45 = arith.subf %41, %44 : vector<1x8x8xf32>
    %46 = math.exp %45 : vector<1x8x8xf32>
    %cst_15 = arith.constant dense<0.000000e+00> : vector<1x8xf32>
    %47 = vector.multi_reduction <add>, %46, %cst_15 [2] : vector<1x8x8xf32> to vector<1x8xf32>
    %48 = vector.shape_cast %47 : vector<1x8xf32> to vector<1x8x1xf32>
    %49 = tpu.reciprocal %48 : vector<1x8x1xf32> -> vector<1x8x1xf32>
    %50 = vector.broadcast %49 : vector<1x8x1xf32> to vector<1x8x8xf32>
    %51 = arith.mulf %46, %50 : vector<1x8x8xf32>
    "tpu.trace_start"() <{level = 10 : i32, message = "bqk,bkd->bqd"}> : () -> ()
    %cst_16 = arith.constant dense<0.000000e+00> : vector<1x8x32xf32>
    %52 = tpu.matmul %51, %39, %cst_16 {dimension_numbers = #tpu.dot_dimension_numbers<[2], [1], [1], [2], [0, 0, 0, 1, 1, 2], [0], [0]>} : vector<1x8x8xf32>, vector<1x8x32xf32>, vector<1x8x32xf32> -> vector<1x8x32xf32>
    "tpu.trace_stop"() : () -> ()
    %53 = vector.extract_strided_slice %26 {offsets = [0, 16], sizes = [8, 16], strides = [1, 1]} : vector<8x128xf32> to vector<8x16xf32>
    %54 = vector.shape_cast %53 : vector<8x16xf32> to vector<1x8x16xf32>
    %55 = vector.extract_strided_slice %26 {offsets = [0, 48], sizes = [8, 16], strides = [1, 1]} : vector<8x128xf32> to vector<8x16xf32>
    %56 = vector.shape_cast %55 : vector<8x16xf32> to vector<1x8x16xf32>
    %57 = vector.extract_strided_slice %26 {offsets = [0, 96], sizes = [8, 32], strides = [1, 1]} : vector<8x128xf32> to vector<8x32xf32>
    %58 = vector.shape_cast %57 : vector<8x32xf32> to vector<1x8x32xf32>
    "tpu.trace_start"() <{level = 10 : i32, message = "bqd,bkd->bqk"}> : () -> ()
    %cst_17 = arith.constant dense<0.000000e+00> : vector<1x8x8xf32>
    %59 = tpu.matmul %54, %56, %cst_17 {dimension_numbers = #tpu.dot_dimension_numbers<[2], [2], [1], [1], [0, 0, 0, 1, 1, 1], [0], [0]>} : vector<1x8x16xf32>, vector<1x8x16xf32>, vector<1x8x8xf32> -> vector<1x8x8xf32>
    "tpu.trace_stop"() : () -> ()
    %60 = arith.addf %59, %33 : vector<1x8x8xf32>
    %cst_18 = arith.constant dense<0xFF800000> : vector<1x8xf32>
    %61 = vector.multi_reduction <maximumf>, %60, %cst_18 [2] : vector<1x8x8xf32> to vector<1x8xf32>
    %62 = vector.shape_cast %61 : vector<1x8xf32> to vector<1x8x1xf32>
    %63 = vector.broadcast %62 : vector<1x8x1xf32> to vector<1x8x8xf32>
    %64 = arith.subf %60, %63 : vector<1x8x8xf32>
    %65 = math.exp %64 : vector<1x8x8xf32>
    %cst_19 = arith.constant dense<0.000000e+00> : vector<1x8xf32>
    %66 = vector.multi_reduction <add>, %65, %cst_19 [2] : vector<1x8x8xf32> to vector<1x8xf32>
    %67 = vector.shape_cast %66 : vector<1x8xf32> to vector<1x8x1xf32>
    %68 = tpu.reciprocal %67 : vector<1x8x1xf32> -> vector<1x8x1xf32>
    %69 = vector.broadcast %68 : vector<1x8x1xf32> to vector<1x8x8xf32>
    %70 = arith.mulf %65, %69 : vector<1x8x8xf32>
    "tpu.trace_start"() <{level = 10 : i32, message = "bqk,bkd->bqd"}> : () -> ()
    %cst_20 = arith.constant dense<0.000000e+00> : vector<1x8x32xf32>
    %71 = tpu.matmul %70, %58, %cst_20 {dimension_numbers = #tpu.dot_dimension_numbers<[2], [1], [1], [2], [0, 0, 0, 1, 1, 2], [0], [0]>} : vector<1x8x8xf32>, vector<1x8x32xf32>, vector<1x8x32xf32> -> vector<1x8x32xf32>
    "tpu.trace_stop"() : () -> ()
    %72 = arith.addf %52, %71 : vector<1x8x32xf32>
    %73 = vector.shape_cast %72 : vector<1x8x32xf32> to vector<8x32xf32>
    %74 = arith.addf %1, %73 : vector<8x32xf32>
    %c0_21 = arith.constant 0 : index
    %c0_22 = arith.constant 0 : index
    %75 = vector.load %arg4[%c0_21, %c0_22] : memref<1x32xf32, #tpu.memory_space<vmem>>, vector<1x32xf32>
    %76 = vector.shape_cast %75 : vector<1x32xf32> to vector<32xf32>
    %77 = vector.shape_cast %76 : vector<32xf32> to vector<1x32xf32>
    %78 = vector.broadcast %77 : vector<1x32xf32> to vector<8x32xf32>
    %79 = arith.addf %74, %78 : vector<8x32xf32>
    %cst_23 = arith.constant dense<0.000000e+00> : vector<8xf32>
    %80 = vector.multi_reduction <add>, %79, %cst_23 [1] : vector<8x32xf32> to vector<8xf32>
    %81 = vector.shape_cast %80 : vector<8xf32> to vector<8x1xf32>
    %cst_24 = arith.constant 3.200000e+01 : f32
    %82 = vector.broadcast %cst_24 : f32 to vector<8x1xf32>
    %83 = arith.divf %81, %82 : vector<8x1xf32>
    %84 = vector.broadcast %83 : vector<8x1xf32> to vector<8x32xf32>
    %85 = arith.subf %79, %84 : vector<8x32xf32>
    %86 = arith.mulf %85, %85 : vector<8x32xf32>
    %cst_25 = arith.constant dense<0.000000e+00> : vector<8xf32>
    %87 = vector.multi_reduction <add>, %86, %cst_25 [1] : vector<8x32xf32> to vector<8xf32>
    %88 = vector.shape_cast %87 : vector<8xf32> to vector<8x1xf32>
    %cst_26 = arith.constant 3.200000e+01 : f32
    %89 = vector.broadcast %cst_26 : f32 to vector<8x1xf32>
    %90 = arith.divf %88, %89 : vector<8x1xf32>
    %91 = vector.broadcast %83 : vector<8x1xf32> to vector<8x32xf32>
    %92 = arith.subf %79, %91 : vector<8x32xf32>
    %cst_27 = arith.constant 9.99999974E-6 : f32
    %93 = vector.broadcast %cst_27 : f32 to vector<8x1xf32>
    %94 = arith.addf %90, %93 : vector<8x1xf32>
    %95 = math.rsqrt %94 : vector<8x1xf32>
    %96 = vector.broadcast %95 : vector<8x1xf32> to vector<8x32xf32>
    %97 = arith.mulf %92, %96 : vector<8x32xf32>
    %c0_28 = arith.constant 0 : index
    %c0_29 = arith.constant 0 : index
    %98 = vector.load %arg5[%c0_28, %c0_29] : memref<32x128xf32, #tpu.memory_space<vmem>>, vector<32x128xf32>
    %cst_30 = arith.constant dense<0.000000e+00> : vector<8x128xf32>
    %99 = tpu.matmul %97, %98, %cst_30 {dimension_numbers = #tpu.dot_dimension_numbers<[1], [0], [0], [1], [0, 0, 1, 1], [], []>} : vector<8x32xf32>, vector<32x128xf32>, vector<8x128xf32> -> vector<8x128xf32>
    %c0_31 = arith.constant 0 : index
    %c0_32 = arith.constant 0 : index
    %100 = vector.load %arg6[%c0_31, %c0_32] : memref<1x128xf32, #tpu.memory_space<vmem>>, vector<1x128xf32>
    %101 = vector.shape_cast %100 : vector<1x128xf32> to vector<128xf32>
    %102 = vector.shape_cast %101 : vector<128xf32> to vector<1x128xf32>
    %103 = vector.broadcast %102 : vector<1x128xf32> to vector<8x128xf32>
    %104 = arith.addf %99, %103 : vector<8x128xf32>
    %cst_33 = arith.constant 0.000000e+00 : f32
    %105 = vector.broadcast %cst_33 : f32 to vector<8x128xf32>
    %106 = arith.maximumf %104, %105 : vector<8x128xf32>
    %c0_34 = arith.constant 0 : index
    %c0_35 = arith.constant 0 : index
    %107 = vector.load %arg7[%c0_34, %c0_35] : memref<128x32xf32, #tpu.memory_space<vmem>>, vector<128x32xf32>
    %cst_36 = arith.constant dense<0.000000e+00> : vector<8x32xf32>
    %108 = tpu.matmul %106, %107, %cst_36 {dimension_numbers = #tpu.dot_dimension_numbers<[1], [0], [0], [1], [0, 0, 1, 1], [], []>} : vector<8x128xf32>, vector<128x32xf32>, vector<8x32xf32> -> vector<8x32xf32>
    %c0_37 = arith.constant 0 : index
    %c0_38 = arith.constant 0 : index
    %109 = vector.load %arg8[%c0_37, %c0_38] : memref<1x32xf32, #tpu.memory_space<vmem>>, vector<1x32xf32>
    %110 = vector.shape_cast %109 : vector<1x32xf32> to vector<32xf32>
    %111 = vector.shape_cast %110 : vector<32xf32> to vector<1x32xf32>
    %112 = vector.broadcast %111 : vector<1x32xf32> to vector<8x32xf32>
    %113 = arith.addf %108, %112 : vector<8x32xf32>
    %114 = arith.addf %79, %113 : vector<8x32xf32>
    %115 = vector.shape_cast %114 : vector<8x32xf32> to vector<1x8x32xf32>
    %c0_39 = arith.constant 0 : index
    %c0_40 = arith.constant 0 : index
    %c0_41 = arith.constant 0 : index
    %116 = vector.load %arg9[%c0_39, %c0_40, %c0_41] : memref<1x8x32xf32, #tpu.memory_space<vmem>>, vector<1x8x32xf32>
    tpu.vector_store %arg9[%c0_39, %c0_40, %c0_41], %115 {strides = array<i32>} : memref<1x8x32xf32, #tpu.memory_space<vmem>>, vector<1x8x32xf32>,
    return
  }
  func.func @transform_0(%arg0: i32) -> (i32, i32, i32) {
    %c0_i32 = arith.constant 0 : i32
    %c0_i32_0 = arith.constant 0 : i32
    %c0_i32_1 = arith.constant 0 : i32
    return %arg0, %c0_i32, %c0_i32_0 : i32, i32, i32
  }
  func.func @transform_1(%arg0: i32) -> (i32, i32) {
    %c0_i32 = arith.constant 0 : i32
    %c0_i32_0 = arith.constant 0 : i32
    %c0_i32_1 = arith.constant 0 : i32
    return %c0_i32, %c0_i32_0 : i32, i32
  }
  func.func @transform_2(%arg0: i32) -> (i32, i32) {
    %c0_i32 = arith.constant 0 : i32
    %c0_i32_0 = arith.constant 0 : i32
    %c0_i32_1 = arith.constant 0 : i32
    return %c0_i32, %c0_i32_0 : i32, i32
  }
  func.func @transform_3(%arg0: i32) -> (i32, i32) {
    %c0_i32 = arith.constant 0 : i32
    %c0_i32_0 = arith.constant 0 : i32
    %c0_i32_1 = arith.constant 0 : i32
    return %c0_i32, %c0_i32_0 : i32, i32
  }
  func.func @transform_4(%arg0: i32) -> (i32, i32) {
    %c0_i32 = arith.constant 0 : i32
    %c0_i32_0 = arith.constant 0 : i32
    %c0_i32_1 = arith.constant 0 : i32
    return %c0_i32, %c0_i32_0 : i32, i32
  }
  func.func @transform_5(%arg0: i32) -> (i32, i32) {
    %c0_i32 = arith.constant 0 : i32
    %c0_i32_0 = arith.constant 0 : i32
    %c0_i32_1 = arith.constant 0 : i32
    return %c0_i32, %c0_i32_0 : i32, i32
  }
  func.func @transform_6(%arg0: i32) -> (i32, i32) {
    %c0_i32 = arith.constant 0 : i32
    %c0_i32_0 = arith.constant 0 : i32
    %c0_i32_1 = arith.constant 0 : i32
    return %c0_i32, %c0_i32_0 : i32, i32
  }
  func.func @transform_7(%arg0: i32) -> (i32, i32) {
    %c0_i32 = arith.constant 0 : i32
    %c0_i32_0 = arith.constant 0 : i32
    %c0_i32_1 = arith.constant 0 : i32
    return %c0_i32, %c0_i32_0 : i32, i32
  }
  func.func @transform_8(%arg0: i32) -> (i32, i32, i32) {
    %c0_i32 = arith.constant 0 : i32
    %c0_i32_0 = arith.constant 0 : i32
    %c0_i32_1 = arith.constant 0 : i32
    return %arg0, %c0_i32, %c0_i32_0 : i32, i32, i32
  }
}

</mosaic_0001>

<bundles_post_ra>
// kernel: tpu_custom_call.1
= control target key start
LH: loop header
LB: loop body
LE: loop exit
PB: predicated region body
PF: predicated region fallthrough
CT: control target
= control target key end

     0   :  { %13 = vsyncpa [#allocation3], 0  ;;  %s1599_s0 = inlined_call_operand.vmem [shape: f32[2,8,32], index: 0, kind: input, shape index: {}]   ;;  %s1600_s1 = inlined_call_operand.vmem [shape: f32[32,128], index: 1, kind: input, shape index: {}]   ;;  %s1601_s2 = inlined_call_operand.vmem [shape: f32[1,128], index: 2, kind: input, shape index: {}]   ;;  %s1602_s3 = inlined_call_operand.vmem [shape: f32[1,32], index: 3, kind: input, shape index: {}]   ;;  %s1603_s4 = inlined_call_operand.vmem [shape: f32[32,128], index: 4, kind: input, shape index: {}]   ;;  %s1604_s5 = inlined_call_operand.vmem [shape: f32[1,128], index: 5, kind: input, shape index: {}]   ;;  %s1605_s6 = inlined_call_operand.vmem [shape: f32[128,32], index: 6, kind: input, shape index: {}]   ;;  %s1606_s7 = inlined_call_operand.vmem [shape: f32[1,32], index: 7, kind: input, shape index: {}]   ;;  %s1607_s8 = inlined_call_operand.hbm [shape: f32[2,8,32], index: 8, kind: output, shape index: {}]  }
   0x1   :  { %15 = vsyncpa [#allocation3 + $0x1], 0  ;;  %s1362_s27 = smov 0   ;;  %s1364_s28 = smov 0  }
   0x2   :  { %s1366_s29 = smov 0   ;;  %s1368_s30 = smov 0  }
   0x3 LB: > { %s1383_s9 = sadd.s32 4294967295, %s1305_s30   ;;  %s1013_s10 = sadd.s32 4294967294, %s1305_s30   ;;  %s1305_s30 = sphi %s1368_s30, %s1613_s30   ;;  %s1301_s29 = sphi %s1366_s29, %s1612_s29   ;;  %s1297_s28 = sphi %s1364_s28, %s1611_s28   ;;  %s1293_s27 = sphi %s1362_s27, %s1610_s27  }
   0x4   : > { %s1387_s11 = sadd.s32 1, %s1305_s30   ;;  %s201_s12 = sadd.s32 1, %s1301_s29 }
   0x5   : > { %s198_s13 = ssub.s32 %s1305_s30, %s1387_s11  ;;  %p211_p0 = scmp.ne.s32.totalorder %s1301_s29, %s1297_s28 }
   0x6   : > { %p199_p1 = scmp.eq.s32.totalorder %s198_s13, 0  ;;  %p212_p2 = scmp.eq.s32.totalorder %s1383_s9, 1 }
   0x7   : > { %p217_p3 = scmp.ne.s32.totalorder %s1297_s28, %s1293_s27  ;;  %p218_p4 = scmp.eq.s32.totalorder %s1013_s10, 1 }
   0x8   : > { %s1398_s14 = scalar_select %p199_p1, %s1301_s29, %s201_s12  }
   0x9   : > { %p1400_p5 = por %p212_p2, %p211_p0  ;;  %p1404_p6 = por %p218_p4, %p217_p3 }
   0xa   : > { %p1016_p7 = scmp.ge.s32.totalorder %s1305_s30, 1  ;;  %p264_p8 = scmp.lt.s32.totalorder %s1305_s30, 3 }
   0xc   : > { %p265_p9 = pnand %p1016_p7, %p264_p8 }
   0xd   : > { %p297_p10 = scmp.lt.s32.totalorder (!%p265_p9), %s1383_s9, 1  ;;  %vm302_vm0 = vcmask (!%p265_p9), 261120   ;;  %v317_v7 = vld [vmem:[%s1600_s1] sm:$0xff] (!%p265_p9)  ;;  %v318_v8 = vld [vmem:[%s1600_s1 + $0x8] sm:$0xff] (!%p265_p9)  ;;  %v319_v9 = vld [vmem:[%s1600_s1 + $0x10] sm:$0xff] (!%p265_p9)  ;;  %v1307_v10 = vmov (!%p265_p9), 0.0|0.0   ;;  %v401_v27 = vlaneseq (!%p265_p9) }
   0xe   : > { %268 = sbr.rel (%p265_p9) target bundleno = 2176 (0x880), region = 52  ;;  %1147 = vmatprep.subr.bf16.mxu0 (!%p265_p9), %v1307_v10  ;;  %v1148_v11 = vpack.c.bf16 (!%p265_p9), %v318_v8, %v317_v7  ;;  %v320_v12 = vld [vmem:[%s1600_s1 + $0x18] sm:$0xff] (!%p265_p9)  ;;  %vm1308_vm1 = vmmov (!%p265_p9), 0   ;;  %v1309_v13 = vmov (!%p265_p9), 0.0   ;;  %1159 = vmatprep.subr.bf16.mxu1 (!%p265_p9), %v1307_v10  ;;  %v1019_v20 = vld [vmem:[%s1601_s2] ss:$0 sm:$0xff] (!%p265_p9) }
   0xf   : > { %1078 = vmatprep.mubr.msk.f32.mxu0 (!%p265_p9), %vm1308_vm1, %v1309_v13  ;;  %1144 = vmatprep.mubr.msk.f32.mxu1 (!%p265_p9), %vm1308_vm1, %v1309_v13  ;;  %v1151_v14 = vpack.c.bf16 (!%p265_p9), %v320_v12, %v319_v9  ;;  %s1310_s19 = smov (!%p265_p9), 112   ;;  %s1311_s20 = smov (!%p265_p9), 96   ;;  %vm410_vm2 = vcmask (!%p265_p9), 130048   ;;  %v402_v28 = vshrl.u32 (!%p265_p9), %v401_v27, 7  ;;  %v404_v29 = vand.u32 (!%p265_p9), 127, %v401_v27  ;;  %v760_v9 = vld [vmem:[%s1603_s4] sm:$0xff] (!%p265_p9) }
  0x10   : > { %1149 = vmatpush3.bf16.msra.mxu0 (!%p265_p9), %v1148_v11  ;;  %v1313_v30 = vmov (!%p265_p9), -inf   ;;  %vm485_vm4 = vcmask (!%p265_p9), 64512   ;;  %s1314_s22 = smov (!%p265_p9), 64   ;;  %s1315_s23 = smov (!%p265_p9), 32   ;;  %v1027_v63 = vld [vmem:[%s1602_s3] ss:$0 sm:$0xff] (!%p265_p9) }
  0x11   : > { %1150 = vmatprep.subr.bf16.mxu0 (!%p265_p9), %v1307_v10  ;;  %vm405_vm3 = vcmp.ge.s32.totalorder (!%p265_p9), %v402_v28, %v404_v29  ;;  %v762_v12 = vld [vmem:[%s1603_s4 + $0x10] sm:$0xff] (!%p265_p9)  ;;  %v853_v27 = vld [vmem:[%s1605_s6 + $0x40] sm:$0xff] (!%p265_p9)  ;;  %v854_v28 = vld [vmem:[%s1605_s6 + $0x48] sm:$0xff] (!%p265_p9)  ;;  %s294_s13 = sand.u32 (!%p265_p9), 1, %s1297_s28   ;;  %s1316_s10 = smov (!%p265_p9), [#allocation2]  }
  0x12   : > { %v406_v31 = vsel (!%p265_p9), %vm405_vm3, 0.0, %v1313_v30  ;;  %v1172_v29 = vpack.c.bf16 (!%p265_p9), %v854_v28, %v853_v27  ;;  %v855_v30 = vld [vmem:[%s1605_s6 + $0x50] sm:$0xff] (!%p265_p9)  ;;  %s941_s26 = scalar_lea.sflag (!%p265_p9), [#allocation3], %s294_s13  ;;  %s1247_s12 = sshll.u32 (!%p265_p9), %s1316_s10, 4  ;;  %s1248_s12 = int_to_ptr.vmem [resolvable:$false] %s1247_s12 }
  0x14   : > { %1152 = vmatpush3.bf16.msra.mxu0 (!%p265_p9), %v1151_v14 }
  0x15   : > { %s298_s17 = scalar_select %p297_p10, %s1383_s9, 1  ;;  %1081 = vmatprep.subr.mxu0 %v1309_v13 }
  0x17   : > { %s1018_s18 = sshll.u32 %s298_s17, 3  ;;  %s1017_s17 = sshll.u32 %s294_s13, 3 }
  0x18   : > { %s300_s21 = scalar_lea.vmem %s1599_s0, %s1018_s18 }
  0x19   : > { %v1415_v0 = vld [vmem:[%s300_s21] sm:$0xff]  ;;  %s1312_s21 = smov 80  }
  0x1a   : > { %v303_v1 = vsel %vm302_vm0, %v1415_v0, 0.0 }
  0x1b   : > { %304 = vadd.xlane.f32.xlu0 %v303_v1 }
  0xa8   : > { %v305_v2 = vpop.xlane.xlu0 %304 }
  0xa9   : > { %v307_v3 = vmul.f32 0.03125, %v305_v2 }
  0xab   : > { %v308_v4 = vsub.f32 %v1415_v0, %v307_v3 }
  0xad   : > { %v309_v5 = vmul.f32 %v308_v4, %v308_v4 }
  0xaf   : > { %v310_v6 = vsel %vm302_vm0, %v309_v5, 0.0 }
  0xb0   : > { %311 = vadd.xlane.f32.xlu0 %v310_v6 }
 0x13d   : > { %v312_v15 = vpop.xlane.xlu0 %311 }
 0x13e   : > { %v313_v16 = vmul.f32 0.03125, %v312_v15  ;;  %v845_v15 = vld [vmem:[%s1605_s6] sm:$0xff] }
 0x140   : > { %v314_v17 = vadd.f32 1e-05, %v313_v16  ;;  %v846_v16 = vld [vmem:[%s1605_s6 + $0x8] sm:$0xff] }
 0x142   : > { %1231 = vrsqrt.f32 %v314_v17  ;;  %v847_v17 = vld [vmem:[%s1605_s6 + $0x10] sm:$0xff] }
 0x14c   : > { %v1232_v18 = vpop.eup %1231 }
 0x14d   : > { %v316_v19 = vmul.f32 %v1232_v18, %v308_v4  ;;  %v1160_v18 = vpack.c.bf16 %v846_v16, %v845_v15 }
 0x14f   : > { %1079 = vmatmul.mubr.msk.f32.vlgmr.msra.gmra.mrb[0].mxu0 %vm302_vm0, %v316_v19  ;;  %v848_v19 = vld [vmem:[%s1605_s6 + $0x18] sm:$0xff]  ;;  %1161 = vmatpush3.bf16.msra.mxu1 %v1160_v18 }
 0x150   : > { %1083 = vmatprep.mubr.msk.f32.mxu0 %vm1308_vm1, %v1309_v13  ;;  %1162 = vmatprep.subr.bf16.mxu1 %v1307_v10 }
 0x222   : > { %v397_v21 = vpop.f32.mrb[0].mxu0 }
 0x223   : > { %v398_v22 = vadd.f32 %v1019_v20, %v397_v21  ;;  %v1080_v23 = vpop.f32.mrb[1].mxu0  ;;  %v1163_v20 = vpack.c.bf16 %v848_v19, %v847_v17  ;;  %v849_v21 = vld [vmem:[%s1605_s6 + $0x20] sm:$0xff] }
 0x225   : > { %497 = vrot.lane.b32.xlu0 %v398_v22, %s1310_s19  ;;  %408 = vrot.lane.b32.xlu1 %v398_v22, %s1311_s20  ;;  %s1032_s20 = sshll.u32 %s1383_s9, 7 }
 0x226   : > { %1164 = vmatpush3.bf16.msra.mxu1 %v1163_v20  ;;  %s1556_s25 = scalar_lea.hbm %s1607_s8, %s1032_s20 }
 0x227   : > { %1165 = vmatprep.subr.bf16.mxu1 %v1307_v10 }
 0x229   : > { %499 = vrot.lane.b32.xlu1 %v398_v22, %s1312_s21  ;;  %s296_s21 = scalar_lea.vmem [#allocation2], %s1017_s17  ;;  %s1249_s17 = scalar_lea.vmem %s1248_s12, 256 }
 0x297   : > { %v409_v24 = vpop.permute.xlu1 %408  ;;  %v498_v26 = vpop.permute.xlu0 %497 }
 0x298   : > { %1082 = vmatpush3.xpose.msk.msra.mxu0 %vm410_vm2, %v409_v24  ;;  %v851_v24 = vld [vmem:[%s1605_s6 + $0x30] sm:$0xff] }
 0x299   : > { %1086 = vmatprep.subr.mxu0 %v1309_v13 }
 0x29b   : > { %1084 = vmatmul.mubr.msk.f32.vlgmr.msra.gmra.mrb[2].mxu0 %vm410_vm2, %v398_v22  ;;  %v500_v25 = vpop.permute.xlu1 %499 }
 0x29c   : > { %1087 = vmatpush3.xpose.msk.msra.mxu0 %vm410_vm2, %v500_v25  ;;  %1088 = vmatprep.mubr.msk.f32.mxu0 %vm1308_vm1, %v1309_v13  ;;  %v852_v25 = vld [vmem:[%s1605_s6 + $0x38] sm:$0xff] }
 0x29d   : > { %1091 = vmatprep.subr.mxu0 %v1309_v13 }
 0x29f   : > { %1089 = vmatmul.mubr.msk.f32.vlgmr.msra.gmra.mrb[4].mxu0 %vm410_vm2, %v498_v26  ;;  %v1169_v26 = vpack.c.bf16 %v852_v25, %v851_v24 }
 0x2a0   : > { %1093 = vmatprep.mubr.msk.f32.mxu0 %vm1308_vm1, %v1309_v13 }
 0x36e   : > { %v481_v32 = vpop.f32.mrb[2].mxu0 }
 0x36f   : > { %v482_v33 = vadd.f32 %v481_v32, %v406_v31  ;;  %v1085_v34 = vpop.f32.mrb[3].mxu0 }
 0x370   : > { %v858_v34 = vld [vmem:[%s1605_s6 + $0x68] sm:$0xff] }
 0x371   : > { %v486_v35 = vsel %vm485_vm4, %v482_v33, -inf }
 0x372   : > { %487 = vmax.xlane.f32.xlu0 %v486_v35  ;;  %v571_v36 = vpop.f32.mrb[4].mxu0 }
 0x373   : > { %v572_v37 = vadd.f32 %v571_v36, %v406_v31  ;;  %v1090_v38 = vpop.f32.mrb[5].mxu0  ;;  %v856_v31 = vld [vmem:[%s1605_s6 + $0x58] sm:$0xff] }
 0x374   : > { %v1175_v32 = vpack.c.bf16 %v856_v31, %v855_v30 }
 0x375   : > { %v575_v39 = vsel %vm485_vm4, %v572_v37, -inf }
 0x376   : > { %576 = vmax.xlane.f32.xlu1 %v575_v39 }
 0x388   : > { %662 = vrot.lane.b32.xlu0 %v398_v22, %s1314_s22  ;;  %s954_s22 = sshll.u32 %s296_s21, 4  ;;  %s1558_s22 = int_to_ptr.vmem [resolvable:$true] %s954_s22 }
 0x389   : > { %s1243_s9 = scalar_lea.vmem %s1558_s22, 128  ;;  %p1250_p0 = scmp.lt.s32.totalorder %s1558_s22, %s1248_s12 }
 0x38a   : > { %p1244_p11 = scmp.ne.s32.totalorder %s1558_s22, %s1243_s9  ;;  %p1251_p1 = scmp.lt.s32.totalorder %s1249_s17, %s1243_s9 }
 0x38c   : > { %p1245_p12 = pnand %p1244_p11, %p1400_p5  ;;  %p1252_p2 = por %p1251_p1, %p1250_p0 }
 0x38e   : > { %p1246_p13 = pneg %p1245_p12 }
 0x390   : > { %p1253_p3 = pnand %p1252_p2, %p1246_p13 }
 0x3ff   : > { %v488_v40 = vpop.xlane.xlu0 %487 }
 0x400   : > { %v489_v41 = vsub.f32 %v482_v33, %v488_v40  ;;  %v857_v33 = vld [vmem:[%s1605_s6 + $0x60] sm:$0xff] }
 0x401   : > { %v1178_v35 = vpack.c.bf16 %v858_v34, %v857_v33 }
 0x402   : > { %v490_v42 = vmul.f32 1.442695, %v489_v41  ;;  %v859_v41 = vld [vmem:[%s1605_s6 + $0x70] sm:$0xff] }
 0x403   : > { %v577_v43 = vpop.xlane.xlu1 %576  ;;  %v663_v56 = vpop.permute.xlu0 %662 }
 0x404   : > { %1233 = vpow2.f32 %v490_v42  ;;  %v578_v44 = vsub.f32 %v572_v37, %v577_v43  ;;  %v860_v42 = vld [vmem:[%s1605_s6 + $0x78] sm:$0xff] }
 0x405   : > { %v1181_v43 = vpack.c.bf16 %v860_v42, %v859_v41 }
 0x406   : > { %v579_v45 = vmul.f32 1.442695, %v578_v44 }
 0x408   : > { %1235 = vpow2.f32 %v579_v45 }
 0x40e   : > { %v1234_v46 = vpop.eup %1233 }
 0x40f   : > { %v492_v47 = vsel %vm485_vm4, %v1234_v46, 0.0 }
 0x410   : > { %493 = vadd.xlane.f32.xlu1 %v492_v47 }
 0x412   : > { %v1236_v48 = vpop.eup %1235 }
 0x413   : > { %v581_v49 = vsel %vm485_vm4, %v1236_v48, 0.0 }
 0x414   : > { %582 = vadd.xlane.f32.xlu1 %v581_v49 }
 0x425   : > { %586 = vrot.lane.b32.xlu1 %v398_v22, %s1315_s23  ;;  %v850_v22 = vld [vmem:[%s1605_s6 + $0x28] sm:$0xff] }
 0x426   : > { %v1166_v23 = vpack.c.bf16 %v850_v22, %v849_v21 }
 0x428   : > { %1167 = vmatpush3.bf16.msra.mxu1 %v1166_v23 }
 0x429   : > { %1168 = vmatprep.subr.bf16.mxu1 %v1307_v10 }
 0x42c   : > { %1170 = vmatpush3.bf16.msra.mxu1 %v1169_v26 }
 0x42d   : > { %1171 = vmatprep.subr.bf16.mxu1 %v1307_v10 }
 0x430   : > { %1173 = vmatpush3.bf16.msra.mxu1 %v1172_v29 }
 0x431   : > { %1174 = vmatprep.subr.bf16.mxu1 %v1307_v10 }
 0x434   : > { %1176 = vmatpush3.bf16.msra.mxu1 %v1175_v32 }
 0x435   : > { %1177 = vmatprep.subr.bf16.mxu1 %v1307_v10 }
 0x438   : > { %1179 = vmatpush3.bf16.msra.mxu1 %v1178_v35 }
 0x439   : > { %1180 = vmatprep.subr.bf16.mxu1 %v1307_v10 }
 0x43c   : > { %1182 = vmatpush3.bf16.msra.mxu1 %v1181_v43 }
 0x49d   : > { %v494_v50 = vpop.xlane.xlu1 %493 }
 0x4a1   : > { %v583_v51 = vpop.xlane.xlu1 %582 }
 0x4a2   : > { %1237 = vrcp.f32 %v583_v51 }
 0x4a3   : > { %1239 = vrcp.f32 %v494_v50 }
 0x4a5   : > { %v587_v52 = vpop.permute.xlu1 %586 }
 0x4a6   : > { %1092 = vmatpush3.msra.mxu0 %v587_v52 }
 0x4a7   : > { %1096 = vmatprep.subr.mxu0 %v1309_v13 }
 0x4ac   : > { %v1238_v53 = vpop.eup %1237 }
 0x4ad   : > { %v585_v54 = vmul.f32 %v1238_v53, %v1236_v48  ;;  %v1240_v55 = vpop.eup %1239  ;;  %v1030_v48 = vld [vmem:[%s1606_s7] ss:$0 sm:$0xff] }
 0x4ae   : > { %v496_v57 = vmul.f32 %v1240_v55, %v1234_v46 }
 0x4af   : > { %1094 = vmatmul.mubr.msk.f32.vlgmr.msra.gmra.mrb[6].mxu0 %vm485_vm4, %v585_v54 }
 0x4b0   : > { %1097 = vmatpush3.msra.mxu0 %v663_v56  ;;  %1098 = vmatprep.mubr.msk.f32.mxu0 %vm1308_vm1, %v1309_v13 }
 0x4b1   : > { %1153 = vmatprep.subr.bf16.mxu0 %v1307_v10 }
 0x4b3   : > { %1099 = vmatmul.mubr.msk.f32.vlgmr.msra.gmra.mrb[8].mxu0 %vm485_vm4, %v496_v57 }
 0x4b4   : > { %1109 = vmatprep.mubr.msk.f32.mxu0 %vm1308_vm1, %v1309_v13  ;;  %v763_v13 = vld [vmem:[%s1603_s4 + $0x18] sm:$0xff] }
 0x4b5   : > { %v1157_v14 = vpack.c.bf16 %v763_v13, %v762_v12 }
 0x582   : > { %v658_v58 = vpop.f32.mrb[6].mxu0 }
 0x583   : > { %v1095_v59 = vpop.f32.mrb[7].mxu0 }
 0x586   : > { %v734_v60 = vpop.f32.mrb[8].mxu0 }
 0x587   : > { %v735_v61 = vadd.f32 %v734_v60, %v658_v58  ;;  %v1100_v62 = vpop.f32.mrb[9].mxu0 }
 0x589   : > { %v738_v1 = vadd.f32 %v735_v61, %v1415_v0  ;;  %v761_v0 = vld [vmem:[%s1603_s4 + $0x8] sm:$0xff] }
 0x58a   : > { %v1154_v11 = vpack.c.bf16 %v761_v0, %v760_v9 }
 0x58b   : > { %v1469_v2 = vadd.f32 %v1027_v63, %v738_v1 }
 0x58c   : > { %1155 = vmatpush3.bf16.msra.mxu0 %v1154_v11 }
 0x58d   : > { %v747_v3 = vsel %vm302_vm0, %v1469_v2, 0.0  ;;  %1156 = vmatprep.subr.bf16.mxu0 %v1307_v10  ;;  %v1028_v10 = vld [vmem:[%s1604_s5] ss:$0 sm:$0xff] }
 0x58e   : > { %748 = vadd.xlane.f32.xlu1 %v747_v3 }
 0x590   : > { %1158 = vmatpush3.bf16.msra.mxu0 %v1157_v14 }
 0x61b   : > { %v749_v4 = vpop.xlane.xlu1 %748 }
 0x61c   : > { %v750_v5 = vmul.f32 0.03125, %v749_v4 }
 0x61e   : > { %v751_v6 = vsub.f32 %v1469_v2, %v750_v5 }
 0x620   : > { %v752_v7 = vmul.f32 %v751_v6, %v751_v6 }
 0x622   : > { %v753_v8 = vsel %vm302_vm0, %v752_v7, 0.0 }
 0x623   : > { %754 = vadd.xlane.f32.xlu0 %v753_v8 }
 0x6b0   : > { %v755_v36 = vpop.xlane.xlu0 %754 }
 0x6b1   : > { %v756_v37 = vmul.f32 0.03125, %v755_v36 }
 0x6b3   : > { %v757_v38 = vadd.f32 1e-05, %v756_v37 }
 0x6b5   : > { %1241 = vrsqrt.f32 %v757_v38 }
 0x6bf   : > { %v1242_v39 = vpop.eup %1241 }
 0x6c0   : > { %v759_v40 = vmul.f32 %v1242_v39, %v751_v6 }
 0x6c2   : > { %1110 = vmatmul.mubr.msk.f32.vlgmr.msra.gmra.mrb[10].mxu0 %vm302_vm0, %v759_v40 }
 0x795   : > { %v840_v44 = vpop.f32.mrb[10].mxu0 }
 0x796   : > { %v841_v45 = vadd.f32 %v1028_v10, %v840_v44  ;;  %v1111_v46 = vpop.f32.mrb[11].mxu0 }
 0x798   : > { %v844_v47 = vmax.f32 %v841_v45, 0.0 }
 0x79a   : > { %1145 = vmatmul.mubr.f32.vlgmr.msra.gmra.mrb[0].mxu1 %v844_v47 }
 0x86d   : > { %v934_v49 = vpop.f32.mrb[0].mxu1 }
 0x86e   : > { %v935_v50 = vadd.f32 %v1030_v48, %v934_v49  ;;  %v1146_v51 = vpop.f32.mrb[1].mxu1 }
 0x870   : > { %v938_v52 = vadd.f32 %v935_v50, %v1469_v2 }
 0x872   : > { %939 = vst.msk [vmem:[%s296_s21] sm:$0xff] %vm302_vm0, %v938_v52 }
 0x873   : > { %1256 = shalt.err (!%p1253_p3)
}
 0x874   : > { %s1257_s13 = scalar_lea.hbm %s1556_s25, 128  ;;  %s1261_s20 = scalar_lea.hbm %s1607_s8, 256 }
 0x875   : > { %p1258_p4 = scmp.ne.s32.totalorder %s1556_s25, %s1257_s13  ;;  %p1262_p9 = scmp.lt.u32.totalorder %s1556_s25, %s1607_s8 }
 0x876   : > { %p1263_p10 = scmp.lt.u32.totalorder %s1261_s20, %s1257_s13  ;;  %p1265_p12 = scmp.lt.u32.totalorder %s1257_s13, %s1556_s25 }
 0x877   : > { %p1259_p7 = pnand %p1258_p4, %p1400_p5 }
 0x878   : > { %p1264_p11 = por %p1263_p10, %p1262_p9 }
 0x879   : > { %p1260_p8 = pneg %p1259_p7 }
 0x87a   : > { %p1266_p13 = por %p1265_p12, %p1264_p11 }
 0x87c   : > { %p1267_p0 = pnand %p1266_p13, %p1260_p8 }
 0x87e   : > { %1270 = shalt.err (!%p1267_p0)
}
 0x87f   : > { %1183 = dma.vmem_to_hbm [thread:$0]  (%p1400_p5), %s1558_s22, 128, %s1556_s25, %s941_s26  }
 0x880 PF: > { %p1189_p1 = scmp.ge.s32.totalorder %s1305_s30, 2  ;;  %s966_s24 = sand.u32 1, %s1293_s27  }
 0x881   : > { %s967_s9 = scalar_lea.sflag [#allocation3], %s966_s24 }
 0x882   : > { %p1186_p2 = pnand %p1189_p1, %p1404_p6 }
 0x884   : > { %1288 = dma.done.wait (!%p1186_p2), %s967_s9, 128  }
 0x885   : > { %1290 = vsyncadd (!%p1186_p2), %s967_s9, 4294967168  ;;  %p18_p3 = scmp.ge.s32.totalorder %s1387_s11, 4   ;;  %s1610_s27 = smov %s1297_s28 }
 0x886   : > { %s1611_s28 = smov %s1301_s29  ;;  %s1612_s29 = smov %s1398_s14 }
 0x887   : > { %s1613_s30 = smov %s1387_s11  ;;  %20 = sbr.rel (!%p18_p3) target bundleno = 3 (0x3), region = 87 }
 0x88e   :  { %972 = vsyncpa [#allocation3], 1 }
 0x88f   :  { %974 = vsyncpa [#allocation3 + $0x1], 1 }

</bundles_post_ra>
